<compile_context>
chip_gen: v7x
topology: tpu7x:2x2x1
jax: 0.10.0
libtpu: 0.0.40
codegen_flags: <defaults>
</compile_context>

<pallas_src>
import functools
import math

import jax
import jax.numpy as jnp
from jax.experimental import pallas as pl
from jax.experimental.pallas import tpu as pltpu


def _conv_gemm_kernel(x_ref, w_ref, b_ref, o_ref, *, c_in, r):
    # x_ref: (tb, Lp, r*c_in)   w_ref: (3*r*c_in, N)   b_ref: (1, N)
    # o_ref: (tb, Lp, N)        with Lp = L // r, N = r * d_model
    tb, Lp, _ = x_ref.shape
    w = w_ref[...]
    b = b_ref[...]
    for bi in range(tb):  # static unroll; tb is kept small (<= 8)
        xe = x_ref[bi]  # (Lp, r*c_in)
        if Lp > 1:
            # circular shift by one packed row along the sequence axis
            prevrow = jnp.concatenate([xe[-1:, :], xe[:-1, :]], axis=0)
            nextrow = jnp.concatenate([xe[1:, :], xe[:1, :]], axis=0)
        else:
            prevrow = xe
            nextrow = xe
        if r > 1:
            # shift by one *sequence position* (= c_in lanes) across packed rows
            a_prev = jnp.concatenate([prevrow[:, -c_in:], xe[:, :-c_in]], axis=1)
            a_next = jnp.concatenate([xe[:, c_in:], nextrow[:, :c_in]], axis=1)
        else:
            a_prev = prevrow
            a_next = nextrow
        xc = jnp.concatenate([a_prev, xe, a_next], axis=1)  # (Lp, 3*r*c_in)
        acc = jnp.dot(
            xc,
            w,
            preferred_element_type=jnp.float32,
            precision=jax.lax.Precision.HIGHEST,
        )
        o_ref[bi] = (acc + b).astype(o_ref.dtype)


def _largest_divisor_leq(n, cap):
    cap = max(1, min(cap, n))
    while n % cap:
        cap -= 1
    return cap


def token_embedding(x, weight, bias, *, target_block_bytes=3 * 1024 * 1024,
                    max_batch_per_step=8):
    """Circular-padded 3-tap Conv1d over the sequence axis (TokenEmbedding.forward).

    x:      (B, L, c_in)        float32
    weight: (d_model, c_in, 3)  torch Conv1d layout
    bias:   (d_model,)
    returns (B, L, d_model)
    """
    B, L, c_in = x.shape
    d_model = weight.shape[0]
    assert weight.shape == (d_model, c_in, 3)

    # ---- lane-dense packing factor: r sequence positions per output vreg row ----
    if d_model % 128 == 0:
        r = 1
    else:
        r = math.lcm(d_model, 128) // d_model
        if r > 32 or L % r != 0:
            r = 1  # fallback: masked (partial-lane) stores
    Lp = L // r
    K = 3 * r * c_in
    N = r * d_model

    # ---- GEMM-layout weight / bias (tiny, built once) ---------------------------
    # Column block j (j = 0..r-1) of the output row holds sequence position (g*r + j);
    # its inputs are taps [prev | mid | next] at lanes j*c_in of each r*c_in group.
    eye_r = jnp.eye(r, dtype=weight.dtype)
    w_big = jnp.concatenate(
        [jnp.kron(eye_r, weight[:, :, k].T) for k in range(3)], axis=0
    )  # (3*r*c_in, r*d_model)
    b_big = jnp.tile(bias, r).reshape(1, N)

    # x only gets a free row-major reshape; no rolled / padded copies in HBM.
    x_p = x.reshape(B, Lp, r * c_in)

    # ---- batch tile: size blocks by bytes, keep grid >= 2 for v7x megacore ------
    in_bytes = Lp * (-(-K // 128) * 128) * 4  # lane-padded VMEM footprint per element
    out_bytes = Lp * N * 4
    tb_cap = max(1, target_block_bytes // max(in_bytes + out_bytes, 1))
    if B >= 2:
        tb_cap = min(tb_cap, max(1, B // 2))  # ensure >= 2 grid steps (megacore)
    tb_cap = min(tb_cap, max_batch_per_step)  # bound static unroll in the kernel
    tb = _largest_divisor_leq(B, tb_cap)
    grid = (B // tb,)

    kernel = functools.partial(_conv_gemm_kernel, c_in=c_in, r=r)

    cost = pl.CostEstimate(
        flops=2 * B * L * (3 * c_in) * d_model,
        transcendentals=0,
        bytes_accessed=4 * (x.size + w_big.size + b_big.size + B * L * d_model),
    )

    out = pl.pallas_call(
        kernel,
        out_shape=jax.ShapeDtypeStruct((B, Lp, N), x.dtype),
        grid_spec=pltpu.PrefetchScalarGridSpec(
            num_scalar_prefetch=0,
            grid=grid,
            in_specs=[
                pl.BlockSpec((tb, Lp, r * c_in), lambda i: (i, 0, 0)),  # x tile
                pl.BlockSpec((K, N), lambda i: (0, 0)),                 # weight (resident)
                pl.BlockSpec((1, N), lambda i: (0, 0)),                 # bias   (resident)
            ],
            out_specs=pl.BlockSpec((tb, Lp, N), lambda i: (i, 0, 0)),
        ),
        compiler_params=pltpu.CompilerParams(
            dimension_semantics=("parallel",),
        ),
        cost_estimate=cost,
    )(x_p, w_big, b_big)

    return out.reshape(B, L, d_model)


if __name__ == "__main__":
    # Small shapes consistent with the module: batch=2, seq=8, c_in=4, d_model=32.
    B, L, c_in, d_model = 2, 8, 4, 32

    key = jax.random.PRNGKey(0)
    kx, kw, kb = jax.random.split(key, 3)

    # Kaiming-normal-ish weight (fan_in = c_in*3, leaky_relu gain), uniform bias.
    fan_in = c_in * 3
    gain = (2.0 / (1.0 + 0.01 ** 2)) ** 0.5
    std = gain / (fan_in ** 0.5)
    weight = std * jax.random.normal(kw, (d_model, c_in, 3), jnp.float32)
    bound = 1.0 / (fan_in ** 0.5)
    bias = jax.random.uniform(kb, (d_model,), jnp.float32, -bound, bound)

    x = jax.random.normal(kx, (B, L, c_in), jnp.float32)

    y = token_embedding(x, weight, bias)
    y = jax.block_until_ready(y)

    # Independent reference: explicit circular pad + lax 1-D conv (NCH / OIH layouts).
    x_t = jnp.transpose(x, (0, 2, 1))                                   # (B, c_in, L)
    x_circ = jnp.concatenate([x_t[:, :, -1:], x_t, x_t[:, :, :1]], axis=-1)
    y_t = jax.lax.conv_general_dilated(
        x_circ, weight, window_strides=(1,), padding="VALID",
        dimension_numbers=("NCH", "OIH", "NCH"),
        precision=jax.lax.Precision.HIGHEST,
    )                                                                   # (B, d_model, L)
    y_ref = jnp.transpose(y_t, (0, 2, 1)) + bias                        # (B, L, d_model)

    assert y.shape == (B, L, d_model)
    assert jnp.allclose(y, y_ref, atol=1e-4, rtol=1e-4), float(jnp.max(jnp.abs(y - y_ref)))

    print("KERNEL_OK")
</pallas_src>

<mosaic_0001>
module attributes {stable_mosaic.version = 11 : i64} {
  func.func @_conv_gemm_kernel(%arg0: i32, %arg1: memref<1x2x16xf32, #tpu.memory_space<vmem>>, %arg2: memref<48x128xf32, #tpu.memory_space<vmem>>, %arg3: memref<1x128xf32, #tpu.memory_space<vmem>>, %arg4: memref<1x2x128xf32, #tpu.memory_space<vmem>>) attributes {dimension_semantics = [#tpu.dimension_semantics<parallel>], iteration_bounds = array<i64: 2>, scalar_prefetch = 0 : i64, scratch_operands = 0 : i64, tpu.core_type = #tpu.core_type<tc>, window_params = [{transform_indices = @transform_0, window_bounds = array<i64: 1, 2, 16>}, {pipeline_mode = #tpu.pipeline_mode<synchronous>, transform_indices = @transform_1, window_bounds = array<i64: 48, 128>}, {pipeline_mode = #tpu.pipeline_mode<synchronous>, transform_indices = @transform_2, window_bounds = array<i64: 1, 128>}, {transform_indices = @transform_3, window_bounds = array<i64: 1, 2, 128>}]} {
    %c0 = arith.constant 0 : index
    %c0_0 = arith.constant 0 : index
    %0 = vector.load %arg2[%c0, %c0_0] : memref<48x128xf32, #tpu.memory_space<vmem>>, vector<48x128xf32>
    %c0_1 = arith.constant 0 : index
    %c0_2 = arith.constant 0 : index
    %1 = vector.load %arg3[%c0_1, %c0_2] : memref<1x128xf32, #tpu.memory_space<vmem>>, vector<1x128xf32>
    %c0_3 = arith.constant 0 : index
    %c0_4 = arith.constant 0 : index
    %c0_5 = arith.constant 0 : index
    %2 = vector.load %arg1[%c0_3, %c0_4, %c0_5] : memref<1x2x16xf32, #tpu.memory_space<vmem>>, vector<1x2x16xf32>
    %3 = vector.shape_cast %2 : vector<1x2x16xf32> to vector<2x16xf32>
    %4 = vector.extract_strided_slice %3 {offsets = [1, 0], sizes = [1, 16], strides = [1, 1]} : vector<2x16xf32> to vector<1x16xf32>
    %5 = vector.extract_strided_slice %3 {offsets = [0, 0], sizes = [1, 16], strides = [1, 1]} : vector<2x16xf32> to vector<1x16xf32>
    %6 = tpu.concatenate %4, %5 in 0 : vector<1x16xf32>, vector<1x16xf32> -> vector<2x16xf32>
    %7 = vector.extract_strided_slice %3 {offsets = [1, 0], sizes = [1, 16], strides = [1, 1]} : vector<2x16xf32> to vector<1x16xf32>
    %8 = vector.extract_strided_slice %3 {offsets = [0, 0], sizes = [1, 16], strides = [1, 1]} : vector<2x16xf32> to vector<1x16xf32>
    %9 = tpu.concatenate %7, %8 in 0 : vector<1x16xf32>, vector<1x16xf32> -> vector<2x16xf32>
    %10 = vector.extract_strided_slice %6 {offsets = [0, 12], sizes = [2, 4], strides = [1, 1]} : vector<2x16xf32> to vector<2x4xf32>
    %11 = vector.extract_strided_slice %3 {offsets = [0, 0], sizes = [2, 12], strides = [1, 1]} : vector<2x16xf32> to vector<2x12xf32>
    %12 = tpu.concatenate %10, %11 in 1 : vector<2x4xf32>, vector<2x12xf32> -> vector<2x16xf32>
    %13 = vector.extract_strided_slice %3 {offsets = [0, 4], sizes = [2, 12], strides = [1, 1]} : vector<2x16xf32> to vector<2x12xf32>
    %14 = vector.extract_strided_slice %9 {offsets = [0, 0], sizes = [2, 4], strides = [1, 1]} : vector<2x16xf32> to vector<2x4xf32>
    %15 = tpu.concatenate %13, %14 in 1 : vector<2x12xf32>, vector<2x4xf32> -> vector<2x16xf32>
    %16 = tpu.concatenate %12, %3, %15 in 1 : vector<2x16xf32>, vector<2x16xf32>, vector<2x16xf32> -> vector<2x48xf32>
    %cst = arith.constant dense<0.000000e+00> : vector<2x128xf32>
    %17 = tpu.matmul %16, %0, %cst {dimension_numbers = #tpu.dot_dimension_numbers<[1], [0], [0], [1], [0, 0, 1, 1], [], []>, precision = #tpu.contract_precision<fp32>} : vector<2x48xf32>, vector<48x128xf32>, vector<2x128xf32> -> vector<2x128xf32>
    %18 = vector.broadcast %1 : vector<1x128xf32> to vector<2x128xf32>
    %19 = arith.addf %17, %18 : vector<2x128xf32>
    %c0_6 = arith.constant 0 : index
    %c0_7 = arith.constant 0 : index
    %c0_8 = arith.constant 0 : index
    %20 = vector.load %arg4[%c0_6, %c0_7, %c0_8] : memref<1x2x128xf32, #tpu.memory_space<vmem>>, vector<1x2x128xf32>
    %21 = vector.shape_cast %20 : vector<1x2x128xf32> to vector<2x128xf32>
    %22 = vector.shape_cast %19 : vector<2x128xf32> to vector<1x2x128xf32>
    tpu.vector_store %arg4[%c0_6, %c0_7, %c0_8], %22 {strides = array<i32>} : memref<1x2x128xf32, #tpu.memory_space<vmem>>, vector<1x2x128xf32>,
    return
  }
  func.func @transform_0(%arg0: i32) -> (i32, i32, i32) {
    %c0_i32 = arith.constant 0 : i32
    %c0_i32_0 = arith.constant 0 : i32
    %c0_i32_1 = arith.constant 0 : i32
    return %arg0, %c0_i32, %c0_i32_0 : i32, i32, i32
  }
  func.func @transform_1(%arg0: i32) -> (i32, i32) {
    %c0_i32 = arith.constant 0 : i32
    %c0_i32_0 = arith.constant 0 : i32
    %c0_i32_1 = arith.constant 0 : i32
    return %c0_i32, %c0_i32_0 : i32, i32
  }
  func.func @transform_2(%arg0: i32) -> (i32, i32) {
    %c0_i32 = arith.constant 0 : i32
    %c0_i32_0 = arith.constant 0 : i32
    %c0_i32_1 = arith.constant 0 : i32
    return %c0_i32, %c0_i32_0 : i32, i32
  }
  func.func @transform_3(%arg0: i32) -> (i32, i32, i32) {
    %c0_i32 = arith.constant 0 : i32
    %c0_i32_0 = arith.constant 0 : i32
    %c0_i32_1 = arith.constant 0 : i32
    return %arg0, %c0_i32, %c0_i32_0 : i32, i32, i32
  }
}

</mosaic_0001>

<bundles_post_ra>
// kernel: tpu_custom_call.1
= control target key start
LH: loop header
LB: loop body
LE: loop exit
PB: predicated region body
PF: predicated region fallthrough
CT: control target
= control target key end

     0   :  { %8 = vsyncpa [#allocation3], 0  ;;  %s1581_s0 = inlined_call_operand.hbm [shape: f32[2,2,16], index: 0, kind: input, shape index: {}]   ;;  %s1582_s1 = inlined_call_operand.hbm [shape: f32[48,128], index: 1, kind: input, shape index: {}]   ;;  %s1583_s2 = inlined_call_operand.vmem [shape: f32[1,128], index: 2, kind: input, shape index: {}]   ;;  %s1584_s3 = inlined_call_operand.hbm [shape: f32[2,2,128], index: 3, kind: output, shape index: {}]  }
   0x1   :  { %10 = vsyncpa [#allocation3 + $0x1], 0 }
   0x2   :  { %11 = vsyncpa [#allocation6], 0 }
   0x3   :  { %12 = vsyncpa [#allocation4], 0 }
   0x4   :  { %14 = vsyncpa [#allocation4 + $0x1], 0  ;;  %s1303_s12 = smov 0   ;;  %s1305_s13 = smov 0  }
   0x5   :  { %s1307_s14 = smov 0   ;;  %s1309_s15 = smov 0  }
   0x6 LB: > { %s1324_s16 = sadd.s32 4294967295, %s1267_s15   ;;  %s860_s17 = sadd.s32 4294967294, %s1267_s15   ;;  %s1267_s15 = sphi %s1309_s15, %s1604_s15   ;;  %s1263_s14 = sphi %s1307_s14, %s1603_s14   ;;  %s1259_s13 = sphi %s1305_s13, %s1602_s13   ;;  %s1255_s12 = sphi %s1303_s12, %s1601_s12  }
   0x7   : > { %p40_p0 = scmp.ne.s32.totalorder %s1259_s13, %s1255_s12  ;;  %p1585_p1 = scmp.eq.s32.totalorder %s1324_s16, 0 }
   0x8   : > { %p112_p3 = scmp.eq.s32.totalorder %s860_s17, 1  ;;  %p861_p5 = scmp.ge.s32.totalorder %s1267_s15, 1 }
   0x9   : > { %p1333_p4 = por %p1585_p1, %p40_p0  ;;  %p119_p7 = scmp.lt.s32.totalorder %s1267_s15, 3 }
   0xa   : > { %p1338_p6 = por %p112_p3, %p40_p0  ;;  %s1269_s21 = smov [#allocation5]  }
   0xb   : > { %s1588_s18 = scalar_select %p1333_p4, 1, 0 }
   0xc   : > { %s1589_s19 = scalar_select %p1338_p6, 1, 0 }
   0xd   : > { %p1343_p8 = pnand %p861_p5, %p119_p7  ;;  %s131_s22 = sshll.u32 %s1269_s21, 4  ;;  %s1347_s22 = int_to_ptr.vmem [resolvable:$true] %s131_s22 }
   0xe   : > { %s1359_s24 = sadd.s32 1, %s1267_s15   ;;  %s27_s25 = sadd.s32 1, %s1263_s14 }
   0xf   : > { %s1590_s20 = scalar_select %p1343_p8, 1, 0 }
  0x10   : > { %p1079_p9 = pneg %p1343_p8  ;;  %s24_s26 = ssub.s32 %s1267_s15, %s1359_s24 }
  0x11   : > { %s1139_s29 = scalar_lea.hbm %s1582_s1, 768 }
  0x12   : > { %p1354_p11 = pnand %p1079_p9, %p1585_p1  ;;  %p1140_p12 = scmp.ne.s32.totalorder %s1582_s1, %s1139_s29 }
  0x13   : > { %p1146_p5 = scmp.lt.u32.totalorder %s1139_s29, %s1582_s1 }
  0x14   : > { %p1141_p13 = pneg %p1354_p11 }
  0x16   : > { %p1142_p0 = pnand %p1141_p13, %p1140_p12 }
  0x18   : > { %p1143_p3 = pneg %p1142_p0 }
  0x1a   : > { %p1148_p7 = pnand %p1146_p5, %p1143_p3 }
  0x1c   : > { %1151 = shalt.err (!%p1148_p7)
}
  0x1d   : > { %s1152_s7 = scalar_lea.vmem %s1347_s22, 768  ;;  %p1160_p2 = scmp.lt.s32.totalorder %s1347_s22, %s1347_s22 }
  0x1e   : > { %p1153_p9 = scmp.ne.s32.totalorder %s1347_s22, %s1152_s7  ;;  %p1161_p6 = scmp.lt.s32.totalorder %s1152_s7, %s1152_s7 }
  0x20   : > { %p1155_p10 = pnand %p1153_p9, %p1141_p13  ;;  %p1162_p4 = por %p1161_p6, %p1160_p2 }
  0x22   : > { %p1156_p1 = pneg %p1155_p10 }
  0x24   : > { %p1163_p8 = pnand %p1162_p4, %p1156_p1 }
  0x26   : > { %1166 = shalt.err (!%p1163_p8)
}
  0x27   : > { %s1270_s8 = smov 128   ;;  %s1271_s9 = smov 8  }
  0x28   : > { %1082 = dma.hbm_to_vmem [thread:$0]  (!%p1354_p11), %s1582_s1, 768, %s1347_s22, [#allocation6], %s1270_s8, %s1270_s8, %s1271_s9  }
  0x29   : > { %p25_p2 = scmp.eq.s32.totalorder %s24_s26, 0  ;;  %p34_p1 = scmp.ne.s32.totalorder %s1263_s14, %s1259_s13 }
  0x2a   : > { %p35_p4 = scmp.eq.s32.totalorder %s1267_s15, 0  ;;  %p1092_p6 = scmp.lt.s32.totalorder %s1267_s15, 2 }
  0x2b   : > { %s1390_s17 = scalar_select %p25_p2, %s1263_s14, %s27_s25  }
  0x2c   : > { %p36_p8 = por %p35_p4, %p34_p1  ;;  %p1592_p10 = scmp.eq.s32.totalorder %s1324_s16, 1 }
  0x2d   : > { %s148_s27 = sand.u32 1, %s1263_s14   ;;  %s865_s28 = sshll.u32 %s1267_s15, 5 }
  0x2e   : > { %p1394_p12 = por %p1592_p10, %p34_p1  ;;  %s864_s29 = sshll.u32 %s148_s27, 1 }
  0x2f   : > { %s1403_s4 = scalar_lea.hbm %s1581_s0, %s865_s28  ;;  %s152_s22 = scalar_lea.vmem [#allocation2], %s864_s29 }
  0x30   : > { %s159_s25 = sshll.u32 %s152_s22, 4  ;;  %p1405_p11 = pnand %p1092_p6, %p36_p8  ;;  %s1409_s25 = int_to_ptr.vmem [resolvable:$true] %s159_s25 }
  0x31   : > { %s149_s5 = scalar_lea.sflag [#allocation3], %s148_s27  ;;  %s1167_s6 = scalar_lea.hbm %s1403_s4, 32 }
  0x32   : > { %p1168_p13 = scmp.ne.s32.totalorder %s1403_s4, %s1167_s6  ;;  %p1169_p0 = pneg %p1405_p11 }
  0x33   : > { %s1172_s9 = scalar_lea.hbm %s1581_s0, 64  ;;  %p1173_p7 = scmp.lt.u32.totalorder %s1403_s4, %s1581_s0 }
  0x34   : > { %p1170_p3 = pnand %p1169_p0, %p1168_p13  ;;  %p1174_p9 = scmp.lt.u32.totalorder %s1172_s9, %s1167_s6 }
  0x35   : > { %p1176_p1 = scmp.lt.u32.totalorder %s1167_s6, %s1403_s4 }
  0x36   : > { %p1171_p5 = pneg %p1170_p3  ;;  %p1175_p2 = por %p1174_p9, %p1173_p7 }
  0x38   : > { %p1177_p4 = por %p1176_p1, %p1175_p2 }
  0x3a   : > { %p1178_p6 = pnand %p1177_p4, %p1171_p5 }
  0x3c   : > { %1181 = shalt.err (!%p1178_p6)
}
  0x3d   : > { %s1182_s27 = scalar_lea.vmem %s1409_s25, 32  ;;  %s1272_s28 = smov [#allocation2]  }
  0x3e   : > { %p1183_p8 = scmp.ne.s32.totalorder %s1409_s25, %s1182_s27  ;;  %s1187_s29 = sshll.u32 %s1272_s28, 4  ;;  %s1188_s29 = int_to_ptr.vmem [resolvable:$false] %s1187_s29 }
  0x3f   : > { %s1189_s23 = scalar_lea.vmem %s1188_s29, 64  ;;  %p1190_p3 = scmp.lt.s32.totalorder %s1409_s25, %s1188_s29 }
  0x40   : > { %p1185_p10 = pnand %p1183_p8, %p1169_p0  ;;  %p1191_p7 = scmp.lt.s32.totalorder %s1189_s23, %s1182_s27 }
  0x42   : > { %p1186_p13 = pneg %p1185_p10  ;;  %p1192_p9 = por %p1191_p7, %p1190_p3 }
  0x44   : > { %p1193_p2 = pnand %p1192_p9, %p1186_p13 }
  0x46   : > { %1196 = shalt.err (!%p1193_p2)
}
  0x47   : > { %1086 = dma.hbm_to_vmem [thread:$0]  (!%p1405_p11), %s1403_s4, 32, %s1409_s25, %s149_s5  }
  0x48   : > { %p1595_p5 = scmp.ne.s32.totalorder %s1590_s20, 0 }
  0x49   : > { %s1439_s30 = sand.u32 (!%p1595_p5), 1, %s1259_s13   ;;  %p1596_p0 = scmp.ne.s32.totalorder (!%p1595_p5), %s1588_s18, 0 }
  0x4a   : > { %168 = sbr.rel (%p1595_p5) target bundleno = 588 (0x24c), region = 32  ;;  %s867_s22 = sshll.u32 (!%p1595_p5), %s1439_s30, 1 }
  0x4b   : > { %s171_s6 = scalar_lea.sflag (!%p1595_p5), [#allocation3], %s1439_s30  ;;  %s174_s7 = scalar_lea.vmem (!%p1595_p5), [#allocation2], %s867_s22 }
  0x51   : > { %1242 = dma.done.wait (%p1596_p0), %s171_s6, 32  }
  0x52   : > { %1244 = vsyncadd (%p1596_p0), %s171_s6, 4294967264  ;;  %p1597_p11 = scmp.eq.s32.totalorder %s1324_s16, 0 }
  0x54   : > { %1246 = dma.done.wait (%p1597_p11), [#allocation6], 768   ;;  %p1598_p1 = pmov %p1597_p11 }
  0x55   : > { %v1273_v0 = vmov 0.0|0.0   ;;  %v208_v1 = vld [vmem:[%s174_s7] sm:$0x3]  ;;  %vm214_vm0 = vcmask 1040384   ;;  %v201_v2 = vld [vmem:[#allocation5] sm:$0xff]  ;;  %v202_v3 = vld [vmem:[#allocation5 + $0x8] sm:$0xff] }
  0x56   : > { %1248 = vsyncadd (%p1598_p1), [#allocation6], 4294966528  ;;  %1034 = vmatprep.subr.bf16.mxu0 %v1273_v0  ;;  %1007 = vmatprep.subr.bf16.mxu1 %v1273_v0  ;;  %s1274_s20 = smov 124   ;;  %v210_v4 = vrot.slane %v208_v1, 1  ;;  %v212_v5 = vrot.slane %v208_v1, 7  ;;  %s1275_s18 = smov 4  }
  0x57   : > { %225 = vrot.lane.b32.xlu0 %v208_v1, %s1274_s20  ;;  %220 = vrot.lane.b32.xlu1 %v208_v1, %s1275_s18  ;;  %v255_v6 = vand.u32 4294901760, %v201_v2  ;;  %v258_v7 = vand.u32 4294901760, %v202_v3  ;;  %s1276_s4 = smov 12   ;;  %s1277_s25 = smov 116   ;;  %v203_v12 = vld [vmem:[#allocation5 + $0x10] sm:$0xff]  ;;  %v204_v13 = vld [vmem:[#allocation5 + $0x18] sm:$0xff] }
  0x58   : > { %v215_v8 = vsel %vm214_vm0, %v210_v4, %v212_v5  ;;  %s1278_s26 = smov 16   ;;  %v261_v14 = vand.u32 4294901760, %v203_v12  ;;  %v264_v15 = vand.u32 4294901760, %v204_v13  ;;  %v205_v17 = vld [vmem:[#allocation5 + $0x20] sm:$0xff]  ;;  %v206_v18 = vld [vmem:[#allocation5 + $0x28] sm:$0xff]  ;;  %vm1279_vm1 = vmmov 0  }
  0x59   : > { %v1455_v9 = vpack.c.bf16 %v258_v7, %v255_v6  ;;  %v1457_v10 = vsub.f32 %v201_v2, %v255_v6  ;;  %v1459_v11 = vsub.f32 %v202_v3, %v258_v7  ;;  %v267_v19 = vand.u32 4294901760, %v205_v17  ;;  %s1281_s5 = smov 32   ;;  %s872_s10 = sshll.u32 %s1324_s16, 5 }
  0x5a   : > { %v1465_v16 = vpack.c.bf16 %v264_v15, %v261_v14  ;;  %v270_v20 = vand.u32 4294901760, %v206_v18  ;;  %v1473_v22 = vsub.f32 %v203_v12, %v261_v14  ;;  %v1475_v23 = vsub.f32 %v204_v13, %v264_v15  ;;  %s200_s11 = scalar_lea.vmem [#allocation7], %s867_s22  ;;  %s1537_s23 = scalar_lea.hbm %s1584_s3, %s872_s10 }
  0x5b   : > { %228 = vrot.lane.b32.xlu0 %v215_v8, %s1276_s4  ;;  %217 = vrot.lane.b32.xlu1 %v215_v8, %s1277_s25  ;;  %v1477_v24 = vsub.f32 %v205_v17, %v267_v19  ;;  %v338_v26 = vand.u32 4294901760, %v1457_v10  ;;  %v345_v27 = vand.u32 4294901760, %v1459_v11  ;;  %v1280_v28 = vmov 0.0   ;;  %s780_s27 = sshll.u32 %s200_s11, 4  ;;  %s767_s6 = scalar_lea.sflag [#allocation4], %s1439_s30  ;;  %s1539_s27 = int_to_ptr.vmem [resolvable:$true] %s780_s27 }
  0x5c   : > { %1036 = vmatpush3.bf16.msra.mxu0 %v1455_v9  ;;  %1009 = vmatpush3.bf16.msra.mxu1 %v1455_v9  ;;  %v1471_v21 = vpack.c.bf16 %v270_v20, %v267_v19  ;;  %v1479_v25 = vsub.f32 %v206_v18, %v270_v20  ;;  %vm231_vm2 = vcmask 97280   ;;  %v352_v35 = vand.u32 4294901760, %v1473_v22  ;;  %s1197_s7 = scalar_lea.vmem %s1539_s27, 32  ;;  %s1282_s16 = smov [#allocation7]  }
  0x5d   : > { %1037 = vmatprep.subr.bf16.mxu0 %v1273_v0  ;;  %1010 = vmatprep.subr.bf16.mxu1 %v1273_v0  ;;  %v1044_v30 = vpack.c.bf16 %v345_v27, %v338_v26  ;;  %v339_v31 = vsub.f32 %v1457_v10, %v338_v26  ;;  %v346_v32 = vsub.f32 %v1459_v11, %v345_v27  ;;  %v359_v36 = vand.u32 4294901760, %v1475_v23  ;;  %p1198_p4 = scmp.ne.s32.totalorder %s1539_s27, %s1197_s7  ;;  %s1201_s22 = sshll.u32 %s1282_s16, 4  ;;  %s1202_s22 = int_to_ptr.vmem [resolvable:$false] %s1201_s22 }
  0x5e   : > { %974 = vmatprep.mubr.msk.f32.mxu0 %vm1279_vm1, %v1280_v28  ;;  %929 = vmatprep.mubr.msk.f32.mxu1 %vm1279_vm1, %v1280_v28  ;;  %v353_v40 = vsub.f32 %v1473_v22, %v352_v35  ;;  %v366_v45 = vand.u32 4294901760, %v1477_v24  ;;  %v373_v46 = vand.u32 4294901760, %v1479_v25  ;;  %v1026_v54 = vpack.c.bf16 %v1459_v11, %v1457_v10  ;;  %s1203_s20 = scalar_lea.vmem %s1202_s22, 64  ;;  %p1204_p10 = scmp.lt.s32.totalorder %s1539_s27, %s1202_s22 }
  0x5f   : > { %233 = vrot.lane.b32.xlu0 %v208_v1, %s1278_s26  ;;  %v340_v33 = vand.u32 4294901760, %v339_v31  ;;  %v347_v34 = vand.u32 4294901760, %v346_v32  ;;  %v1047_v39 = vpack.c.bf16 %v359_v36, %v352_v35  ;;  %v360_v41 = vsub.f32 %v1475_v23, %v359_v36  ;;  %p1199_p6 = pnand %p1198_p4, %p1394_p12  ;;  %p1205_p13 = scmp.lt.s32.totalorder %s1203_s20, %s1197_s7 }
  0x60   : > { %1039 = vmatpush3.bf16.msra.mxu0 %v1465_v16  ;;  %1012 = vmatpush3.bf16.msra.mxu1 %v1465_v16  ;;  %v354_v43 = vand.u32 4294901760, %v353_v40  ;;  %v1050_v48 = vpack.c.bf16 %v373_v46, %v366_v45  ;;  %v367_v49 = vsub.f32 %v1477_v24, %v366_v45  ;;  %v374_v50 = vsub.f32 %v1479_v25, %v373_v46 }
  0x61   : > { %1040 = vmatprep.subr.bf16.mxu0 %v1273_v0  ;;  %1013 = vmatprep.subr.bf16.mxu1 %v1273_v0  ;;  %v1017_v38 = vpack.c.bf16 %v347_v34, %v340_v33  ;;  %v361_v44 = vand.u32 4294901760, %v360_v41  ;;  %v1029_v55 = vpack.c.bf16 %v1475_v23, %v1473_v22  ;;  %v1032_v56 = vpack.c.bf16 %v1479_v25, %v1477_v24  ;;  %p1200_p8 = pneg %p1199_p6  ;;  %p1206_p3 = por %p1205_p13, %p1204_p10 }
  0x62   : > { %v368_v51 = vand.u32 4294901760, %v367_v49  ;;  %v375_v52 = vand.u32 4294901760, %v374_v50  ;;  %vm223_vm3 = vcmask 31744   ;;  %vm240_vm4 = vcmask 130048  }
  0x63   : > { %v1020_v47 = vpack.c.bf16 %v361_v44, %v354_v43  ;;  %vm242_vm5 = vcmask 261120   ;;  %vm250_vm6 = vcmask 392192   ;;  %p1207_p7 = pnand %p1206_p3, %p1200_p8 }
  0x64   : > { %1042 = vmatpush3.bf16.msra.mxu0 %v1471_v21  ;;  %1015 = vmatpush3.bf16.msra.mxu1 %v1471_v21  ;;  %v1023_v53 = vpack.c.bf16 %v375_v52, %v368_v51 }
  0x65   : > { %1043 = vmatprep.subr.bf16.mxu0 %v1273_v0  ;;  %1016 = vmatprep.subr.bf16.mxu1 %v1273_v0 }
  0xc9   : > { %v226_v29 = vpop.permute.xlu0 %225  ;;  %v221_v57 = vpop.permute.xlu1 %220 }
  0xcd   : > { %v229_v37 = vpop.permute.xlu0 %228  ;;  %v218_v58 = vpop.permute.xlu1 %217 }
  0xce   : > { %v232_v42 = vsel %vm231_vm2, %v226_v29, %v229_v37  ;;  %v224_v59 = vsel %vm223_vm3, %v218_v58, %v221_v57 }
  0xcf   : > { %237 = vrot.lane.b32.xlu1 %v232_v42, %s1281_s5 }
  0xd1   : > { %v234_v60 = vpop.permute.xlu0 %233 }
  0xd2   : > { %v241_v61 = vsel %vm240_vm4, %v224_v59, %v234_v60 }
 0x141   : > { %v238_v62 = vpop.permute.xlu1 %237 }
 0x142   : > { %v243_v63 = vsel %vm242_vm5, %v241_v61, %v238_v62 }
 0x143   : > { %v252_v1 = vsel %vm250_vm6, %v243_v63, 0 }
 0x144   : > { %v325_v2 = vand.u32 4294901760, %v252_v1 }
 0x146   : > { %v326_v3 = vsub.f32 %v252_v1, %v325_v2 }
 0x148   : > { %v327_v4 = vand.u32 4294901760, %v326_v3 }
 0x14a   : > { %975 = vmatmul.mubr.f32.vlgmr.msra.gmra.mrb[0].mxu0 %v327_v4  ;;  %v328_v5 = vsub.f32 %v326_v3, %v327_v4 }
 0x14b   : > { %1045 = vmatpush3.bf16.msra.mxu0 %v1044_v30  ;;  %989 = vmatprep.mubr.msk.f32.mxu0 %vm1279_vm1, %v1280_v28 }
 0x14c   : > { %1046 = vmatprep.subr.bf16.mxu0 %v1273_v0  ;;  %v329_v6 = vand.u32 4294901760, %v328_v5 }
 0x14e   : > { %930 = vmatmul.mubr.f32.vlgmr.msra.gmra.mrb[0].mxu1 %v329_v6 }
 0x14f   : > { %1018 = vmatpush3.bf16.msra.mxu1 %v1017_v38  ;;  %1048 = vmatpush3.bf16.msra.mxu0 %v1047_v39 }
 0x150   : > { %1019 = vmatprep.subr.bf16.mxu1 %v1273_v0  ;;  %1049 = vmatprep.subr.bf16.mxu0 %v1273_v0 }
 0x151   : > { %944 = vmatprep.mubr.msk.f32.mxu1 %vm1279_vm1, %v1280_v28 }
 0x153   : > { %1021 = vmatpush3.bf16.msra.mxu1 %v1020_v47  ;;  %1051 = vmatpush3.bf16.msra.mxu0 %v1050_v48 }
 0x154   : > { %1022 = vmatprep.subr.bf16.mxu1 %v1273_v0  ;;  %1052 = vmatprep.subr.bf16.mxu0 %v1273_v0 }
 0x156   : > { %990 = vmatmul.mubr.f32.vlgmr.msra.gmra.mrb[0].mxu0 %v325_v2 }
 0x157   : > { %1024 = vmatpush3.bf16.msra.mxu1 %v1023_v53  ;;  %1054 = vmatpush3.bf16.msra.mxu0 %v1455_v9  ;;  %v870_v9 = vld [vmem:[%s1583_s2] ss:$0 sm:$0xff] }
 0x158   : > { %1025 = vmatprep.subr.bf16.mxu1 %v1273_v0  ;;  %1055 = vmatprep.subr.bf16.mxu0 %v1273_v0 }
 0x159   : > { %1004 = vmatprep.mubr.msk.f32.mxu0 %vm1279_vm1, %v1280_v28 }
 0x15a   : > { %945 = vmatmul.mubr.f32.vlgmr.msra.gmra.mrb[0].mxu1 %v325_v2 }
 0x15b   : > { %1027 = vmatpush3.bf16.msra.mxu1 %v1026_v54  ;;  %1057 = vmatpush3.bf16.msra.mxu0 %v1465_v16 }
 0x15c   : > { %1028 = vmatprep.subr.bf16.mxu1 %v1273_v0  ;;  %1058 = vmatprep.subr.bf16.mxu0 %v1273_v0 }
 0x15d   : > { %959 = vmatprep.mubr.msk.f32.mxu1 %vm1279_vm1, %v1280_v28 }
 0x15f   : > { %1030 = vmatpush3.bf16.msra.mxu1 %v1029_v55  ;;  %1060 = vmatpush3.bf16.msra.mxu0 %v1471_v21 }
 0x160   : > { %1031 = vmatprep.subr.bf16.mxu1 %v1273_v0 }
 0x162   : > { %1005 = vmatmul.mubr.f32.vlgmr.msra.gmra.mrb[0].mxu0 %v325_v2 }
 0x163   : > { %1033 = vmatpush3.bf16.msra.mxu1 %v1032_v56 }
 0x166   : > { %960 = vmatmul.mubr.f32.vlgmr.msra.gmra.mrb[0].mxu1 %v326_v3 }
 0x235   : > { %v761_v7 = vpop.f32.mrb[0].mxu0 }
 0x236   : > { %v1006_v8 = vpop.f32.mrb[1].mxu0 }
 0x239   : > { %v516_v10 = vpop.f32.mrb[0].mxu1 }
 0x23a   : > { %v1061_v11 = vadd.f32 %v870_v9, %v516_v10  ;;  %v961_v12 = vpop.f32.mrb[1].mxu1 }
 0x23c   : > { %v1062_v13 = vadd.f32 %v1061_v11, %v761_v7 }
 0x23e   : > { %765 = vst [vmem:[%s200_s11] sm:$0x3] %v1062_v13 }
 0x23f   : > { %1210 = shalt.err (!%p1207_p7)
}
 0x240   : > { %s1211_s30 = scalar_lea.hbm %s1537_s23, 32  ;;  %s1215_s25 = scalar_lea.hbm %s1584_s3, 64 }
 0x241   : > { %p1212_p9 = scmp.ne.s32.totalorder %s1537_s23, %s1211_s30  ;;  %p1216_p0 = scmp.lt.u32.totalorder %s1537_s23, %s1584_s3 }
 0x242   : > { %p1217_p11 = scmp.lt.u32.totalorder %s1215_s25, %s1211_s30  ;;  %p1219_p4 = scmp.lt.u32.totalorder %s1211_s30, %s1537_s23 }
 0x243   : > { %p1213_p2 = pnand %p1212_p9, %p1394_p12 }
 0x244   : > { %p1218_p1 = por %p1217_p11, %p1216_p0 }
 0x245   : > { %p1214_p5 = pneg %p1213_p2 }
 0x246   : > { %p1220_p6 = por %p1219_p4, %p1218_p1 }
 0x248   : > { %p1221_p8 = pnand %p1220_p6, %p1214_p5 }
 0x24a   : > { %1224 = shalt.err (!%p1221_p8)
}
 0x24b   : > { %1077 = dma.vmem_to_hbm [thread:$0]  (%p1394_p12), %s1539_s27, 32, %s1537_s23, %s767_s6  }
 0x24c PF: > { %s792_s8 = sand.u32 1, %s1255_s12   ;;  %p1599_p10 = scmp.ne.s32.totalorder %s1589_s19, 0 }
 0x24d   : > { %p1600_p13 = scmp.ge.s32.totalorder %s1267_s15, 2  ;;  %s793_s9 = scalar_lea.sflag [#allocation4], %s792_s8 }
 0x24f   : > { %p1088_p3 = pnand %p1600_p13, %p1599_p10 }
 0x251   : > { %1250 = dma.done.wait (!%p1088_p3), %s793_s9, 32  }
 0x252   : > { %1252 = vsyncadd (!%p1088_p3), %s793_s9, 4294967264  ;;  %p17_p7 = scmp.ge.s32.totalorder %s1359_s24, 4   ;;  %s1601_s12 = smov %s1259_s13 }
 0x253   : > { %s1602_s13 = smov %s1263_s14  ;;  %s1603_s14 = smov %s1390_s17 }
 0x254   : > { %s1604_s15 = smov %s1359_s24  ;;  %19 = sbr.rel (!%p17_p7) target bundleno = 6 (0x6), region = 81 }
 0x25b   :  { %798 = vsyncpa [#allocation3], 1 }
 0x25c   :  { %800 = vsyncpa [#allocation3 + $0x1], 1 }
 0x25d   :  { %801 = vsyncpa [#allocation6], 1 }
 0x25e   :  { %802 = vsyncpa [#allocation4], 1 }
 0x25f   :  { %804 = vsyncpa [#allocation4 + $0x1], 1 }

</bundles_post_ra>
